<compile_context>
chip_gen: v7x
topology: tpu7x:2x2x1
jax: 0.10.0
libtpu: 0.0.40
codegen_flags: <defaults>
</compile_context>

<pallas_src>
import functools

import jax
import jax.numpy as jnp
from jax.experimental import pallas as pl
from jax.experimental.pallas import tpu as pltpu

# Layer sizes implied by the module's __init__
IN_DIM = 52 * 4 + 16 * 4 + 4 * 4  # 288
DIMS = [IN_DIM, 256, 128, 64, 64, 64, 64, 52]
NUM_LAYERS = len(DIMS) - 1  # 7

# Feature dims padded up to >= 128 so every layer is lane-dense on the MXU/VPU.
PAD_DIMS = [d if d >= 128 else 128 for d in DIMS]   # [288,256,128,128,128,128,128,128]

OUT_DIM = DIMS[-1]        # 52 (real outputs)
OUT_PAD = PAD_DIMS[-1]    # 128 (lane-dense padded output width)
TB_MAX = 2048             # max batch tile (multiple of 8); ~15 MiB live VMEM at 2048
VMEM_LIMIT_BYTES = 32 * 1024 * 1024  # headroom for big tiles, esp. on v5e (16 MiB default)


def _round_up(x, m):
    return ((x + m - 1) // m) * m


def _mlp_kernel(x_ref, *refs):
    """Fused MLP forward for one batch tile. refs = (w1,b1,...,w7,b7, out_ref)."""
    out_ref = refs[-1]
    param_refs = refs[:-1]

    h = x_ref[...]                                   # (TB, 288) f32 or bf16
    for layer in range(NUM_LAYERS):
        w = param_refs[2 * layer][...]               # (in_pad, out_pad) bf16, VMEM-resident
        b = param_refs[2 * layer + 1][...]           # (1, out_pad)      f32
        h = jnp.dot(h.astype(jnp.bfloat16), w,
                    preferred_element_type=jnp.float32) + b
        if layer < NUM_LAYERS - 1:
            h = jnp.maximum(h, 0.0)                  # ReLU in f32 (v5e-friendly)
    out_ref[...] = h.astype(out_ref.dtype)           # (TB, 128) lane-dense store


def prepare_params(params):
    """One-time param prep: zero-pad narrow layers to 128 features, cast weights to bf16.

    Input:  flat list [w1, b1, ..., w7, b7] with w_i (in, out) f32, b_i (1, out) f32.
    Output: same structure, weights bf16 padded to (PAD_DIMS[i], PAD_DIMS[i+1]),
            biases f32 padded to (1, PAD_DIMS[i+1]). Padding is exact: zero weight
            rows/cols and zero bias lanes contribute nothing to the real outputs.
    """
    prepped = []
    for i in range(NUM_LAYERS):
        w = params[2 * i]
        b = params[2 * i + 1]
        pin, pout = PAD_DIMS[i], PAD_DIMS[i + 1]
        w = jnp.pad(w, ((0, pin - w.shape[0]), (0, pout - w.shape[1])))
        b = jnp.pad(b, ((0, 0), (0, pout - b.shape[1])))
        prepped.append(w.astype(jnp.bfloat16))
        prepped.append(b.astype(jnp.float32))
    return prepped


@functools.partial(jax.jit, static_argnames=("block_b",))
def nn_third_forward(x, prepped_params, block_b=TB_MAX):
    """x: (B, 288) f32 or bf16; prepped_params: output of prepare_params().

    Returns (B, 52) f32.
    """
    B = x.shape[0]

    # Batch tile: multiple of 8, capped at block_b. When B > 8, also cap at
    # ceil(B/2) so the "parallel" batch axis has >= 2 steps (v7x: 2 TensorCores).
    TB = min(block_b, _round_up(max(B, 1), 8))
    if B > 8:
        TB = min(TB, _round_up(pl.cdiv(B, 2), 8))
    TB = max(TB, 8)

    # No input padding: Pallas handles the ragged last block (reads past B are
    # compute-only garbage rows; their stores are masked).
    grid = (pl.cdiv(B, TB),)

    # x / out tiled over the batch; all params full-array and pinned across steps.
    in_specs = [pl.BlockSpec((TB, IN_DIM), lambda i: (i, 0))]
    for p in prepped_params:
        in_specs.append(pl.BlockSpec(p.shape, lambda i: (0, 0)))
    out_spec = pl.BlockSpec((TB, OUT_PAD), lambda i: (i, 0))

    # Advisory cost estimate (padded layer widths).
    flops = 2 * B * sum(m * n for m, n in zip(PAD_DIMS[:-1], PAD_DIMS[1:]))
    param_bytes = sum(int(p.size) * p.dtype.itemsize for p in prepped_params)
    bytes_accessed = B * IN_DIM * x.dtype.itemsize + B * OUT_PAD * 4 + param_bytes

    out = pl.pallas_call(
        _mlp_kernel,
        out_shape=jax.ShapeDtypeStruct((B, OUT_PAD), jnp.float32),
        grid=grid,
        in_specs=in_specs,
        out_specs=out_spec,
        compiler_params=pltpu.CompilerParams(
            dimension_semantics=("parallel",),
            vmem_limit_bytes=VMEM_LIMIT_BYTES),
        cost_estimate=pl.CostEstimate(
            flops=flops, transcendentals=0, bytes_accessed=bytes_accessed),
    )(x, *prepped_params)

    # TODO(synk): if the consumer tolerates it, return the padded (B, 128) buffer
    # (or a bf16 output) and slice lazily downstream to save the extra XLA pass.
    return out[:, :OUT_DIM]


def init_params(key):
    """Deterministic init mimicking nn.Linear defaults (uniform +-1/sqrt(fan_in))."""
    params = []
    for i in range(NUM_LAYERS):
        fan_in, fan_out = DIMS[i], DIMS[i + 1]
        key, kw, kb = jax.random.split(key, 3)
        bound = 1.0 / (fan_in ** 0.5)
        # Stored as (in, out) so the kernel does x @ W (== PyTorch x @ W.T).
        w = jax.random.uniform(kw, (fan_in, fan_out), jnp.float32, -bound, bound)
        b = jax.random.uniform(kb, (1, fan_out), jnp.float32, -bound, bound)
        params.append(w)
        params.append(b)
    return params


def reference_forward_bf16(x, params):
    """Plain-JAX reference with the same bf16-inputs / f32-accumulate precision path."""
    h = x
    for i in range(NUM_LAYERS):
        w, b = params[2 * i], params[2 * i + 1]
        h = jnp.dot(h.astype(jnp.bfloat16), w.astype(jnp.bfloat16),
                    preferred_element_type=jnp.float32) + b
        if i < NUM_LAYERS - 1:
            h = jnp.maximum(h, 0.0)
    return h


def reference_forward_f32(x, params):
    """Full-f32 reference (loose check only; kernel uses bf16 matmul inputs)."""
    h = x
    for i in range(NUM_LAYERS):
        w, b = params[2 * i], params[2 * i + 1]
        h = h @ w + b
        if i < NUM_LAYERS - 1:
            h = jnp.maximum(h, 0.0)
    return h


if __name__ == "__main__":
    key = jax.random.PRNGKey(0)
    key, kx1, kx2 = jax.random.split(key, 3)
    params = init_params(key)
    prepped = prepare_params(params)

    # --- small-batch check (single grid step) ---
    batch = 8
    x = jax.random.normal(kx1, (batch, IN_DIM), jnp.float32)
    out = jax.block_until_ready(nn_third_forward(x, prepped))
    assert out.shape == (batch, OUT_DIM), out.shape

    ref_bf16 = reference_forward_bf16(x, params)
    ref_f32 = reference_forward_f32(x, params)
    assert jnp.allclose(out, ref_bf16, atol=2e-3, rtol=2e-3), "mismatch vs bf16 reference"
    assert jnp.allclose(out, ref_f32, atol=1e-1, rtol=1e-1), "mismatch vs f32 reference"

    # --- multi-tile check (batch grid + ragged, unpadded last block) ---
    batch2 = 44
    x2 = jax.random.normal(kx2, (batch2, IN_DIM), jnp.float32)
    out2 = jax.block_until_ready(nn_third_forward(x2, prepped, block_b=16))
    assert out2.shape == (batch2, OUT_DIM), out2.shape
    ref2 = reference_forward_bf16(x2, params)
    assert jnp.allclose(out2, ref2, atol=2e-3, rtol=2e-3), "mismatch vs bf16 reference (tiled)"

    # --- bf16-input path (half the input HBM traffic; layer-0 cast is a no-op) ---
    x_bf16 = x.astype(jnp.bfloat16)
    out3 = jax.block_until_ready(nn_third_forward(x_bf16, prepped))
    ref3 = reference_forward_bf16(x_bf16.astype(jnp.float32), params)
    assert out3.shape == (batch, OUT_DIM), out3.shape
    assert jnp.allclose(out3, ref3, atol=2e-3, rtol=2e-3), "mismatch vs bf16 reference (bf16 x)"

    print("KERNEL_OK")
</pallas_src>

<mosaic_0001>
module attributes {stable_mosaic.version = 11 : i64} {
  func.func @_mlp_kernel(%arg0: i32, %arg1: memref<8x288xf32, #tpu.memory_space<vmem>>, %arg2: memref<288x256xbf16, #tpu.memory_space<vmem>>, %arg3: memref<1x256xf32, #tpu.memory_space<vmem>>, %arg4: memref<256x128xbf16, #tpu.memory_space<vmem>>, %arg5: memref<1x128xf32, #tpu.memory_space<vmem>>, %arg6: memref<128x128xbf16, #tpu.memory_space<vmem>>, %arg7: memref<1x128xf32, #tpu.memory_space<vmem>>, %arg8: memref<128x128xbf16, #tpu.memory_space<vmem>>, %arg9: memref<1x128xf32, #tpu.memory_space<vmem>>, %arg10: memref<128x128xbf16, #tpu.memory_space<vmem>>, %arg11: memref<1x128xf32, #tpu.memory_space<vmem>>, %arg12: memref<128x128xbf16, #tpu.memory_space<vmem>>, %arg13: memref<1x128xf32, #tpu.memory_space<vmem>>, %arg14: memref<128x128xbf16, #tpu.memory_space<vmem>>, %arg15: memref<1x128xf32, #tpu.memory_space<vmem>>, %arg16: memref<8x128xf32, #tpu.memory_space<vmem>>) attributes {dimension_semantics = [#tpu.dimension_semantics<parallel>], iteration_bounds = array<i64: 1>, scalar_prefetch = 0 : i64, scratch_operands = 0 : i64, tpu.core_type = #tpu.core_type<tc>, window_params = [{transform_indices = @transform_0, window_bounds = array<i64: 8, 288>}, {pipeline_mode = #tpu.pipeline_mode<synchronous>, transform_indices = @transform_1, window_bounds = array<i64: 288, 256>}, {pipeline_mode = #tpu.pipeline_mode<synchronous>, transform_indices = @transform_2, window_bounds = array<i64: 1, 256>}, {pipeline_mode = #tpu.pipeline_mode<synchronous>, transform_indices = @transform_3, window_bounds = array<i64: 256, 128>}, {pipeline_mode = #tpu.pipeline_mode<synchronous>, transform_indices = @transform_4, window_bounds = array<i64: 1, 128>}, {pipeline_mode = #tpu.pipeline_mode<synchronous>, transform_indices = @transform_5, window_bounds = array<i64: 128, 128>}, {pipeline_mode = #tpu.pipeline_mode<synchronous>, transform_indices = @transform_6, window_bounds = array<i64: 1, 128>}, {pipeline_mode = #tpu.pipeline_mode<synchronous>, transform_indices = @transform_7, window_bounds = array<i64: 128, 128>}, {pipeline_mode = #tpu.pipeline_mode<synchronous>, transform_indices = @transform_8, window_bounds = array<i64: 1, 128>}, {pipeline_mode = #tpu.pipeline_mode<synchronous>, transform_indices = @transform_9, window_bounds = array<i64: 128, 128>}, {pipeline_mode = #tpu.pipeline_mode<synchronous>, transform_indices = @transform_10, window_bounds = array<i64: 1, 128>}, {pipeline_mode = #tpu.pipeline_mode<synchronous>, transform_indices = @transform_11, window_bounds = array<i64: 128, 128>}, {pipeline_mode = #tpu.pipeline_mode<synchronous>, transform_indices = @transform_12, window_bounds = array<i64: 1, 128>}, {pipeline_mode = #tpu.pipeline_mode<synchronous>, transform_indices = @transform_13, window_bounds = array<i64: 128, 128>}, {pipeline_mode = #tpu.pipeline_mode<synchronous>, transform_indices = @transform_14, window_bounds = array<i64: 1, 128>}, {transform_indices = @transform_15, window_bounds = array<i64: 8, 128>}]} {
    %c0 = arith.constant 0 : index
    %c0_0 = arith.constant 0 : index
    %0 = vector.load %arg1[%c0, %c0_0] : memref<8x288xf32, #tpu.memory_space<vmem>>, vector<8x288xf32>
    %c0_1 = arith.constant 0 : index
    %c0_2 = arith.constant 0 : index
    %1 = vector.load %arg2[%c0_1, %c0_2] : memref<288x256xbf16, #tpu.memory_space<vmem>>, vector<288x256xbf16>
    %c0_3 = arith.constant 0 : index
    %c0_4 = arith.constant 0 : index
    %2 = vector.load %arg3[%c0_3, %c0_4] : memref<1x256xf32, #tpu.memory_space<vmem>>, vector<1x256xf32>
    %3 = arith.truncf %0 : vector<8x288xf32> to vector<8x288xbf16>
    %cst = arith.constant dense<0.000000e+00> : vector<8x256xf32>
    %4 = tpu.matmul %3, %1, %cst {dimension_numbers = #tpu.dot_dimension_numbers<[1], [0], [0], [1], [0, 0, 1, 1], [], []>} : vector<8x288xbf16>, vector<288x256xbf16>, vector<8x256xf32> -> vector<8x256xf32>
    %5 = vector.broadcast %2 : vector<1x256xf32> to vector<8x256xf32>
    %6 = arith.addf %4, %5 : vector<8x256xf32>
    %cst_5 = arith.constant 0.000000e+00 : f32
    %7 = vector.broadcast %cst_5 : f32 to vector<8x256xf32>
    %8 = arith.maximumf %6, %7 : vector<8x256xf32>
    %c0_6 = arith.constant 0 : index
    %c0_7 = arith.constant 0 : index
    %9 = vector.load %arg4[%c0_6, %c0_7] : memref<256x128xbf16, #tpu.memory_space<vmem>>, vector<256x128xbf16>
    %c0_8 = arith.constant 0 : index
    %c0_9 = arith.constant 0 : index
    %10 = vector.load %arg5[%c0_8, %c0_9] : memref<1x128xf32, #tpu.memory_space<vmem>>, vector<1x128xf32>
    %11 = arith.truncf %8 : vector<8x256xf32> to vector<8x256xbf16>
    %cst_10 = arith.constant dense<0.000000e+00> : vector<8x128xf32>
    %12 = tpu.matmul %11, %9, %cst_10 {dimension_numbers = #tpu.dot_dimension_numbers<[1], [0], [0], [1], [0, 0, 1, 1], [], []>} : vector<8x256xbf16>, vector<256x128xbf16>, vector<8x128xf32> -> vector<8x128xf32>
    %13 = vector.broadcast %10 : vector<1x128xf32> to vector<8x128xf32>
    %14 = arith.addf %12, %13 : vector<8x128xf32>
    %cst_11 = arith.constant 0.000000e+00 : f32
    %15 = vector.broadcast %cst_11 : f32 to vector<8x128xf32>
    %16 = arith.maximumf %14, %15 : vector<8x128xf32>
    %c0_12 = arith.constant 0 : index
    %c0_13 = arith.constant 0 : index
    %17 = vector.load %arg6[%c0_12, %c0_13] : memref<128x128xbf16, #tpu.memory_space<vmem>>, vector<128x128xbf16>
    %c0_14 = arith.constant 0 : index
    %c0_15 = arith.constant 0 : index
    %18 = vector.load %arg7[%c0_14, %c0_15] : memref<1x128xf32, #tpu.memory_space<vmem>>, vector<1x128xf32>
    %19 = arith.truncf %16 : vector<8x128xf32> to vector<8x128xbf16>
    %cst_16 = arith.constant dense<0.000000e+00> : vector<8x128xf32>
    %20 = tpu.matmul %19, %17, %cst_16 {dimension_numbers = #tpu.dot_dimension_numbers<[1], [0], [0], [1], [0, 0, 1, 1], [], []>} : vector<8x128xbf16>, vector<128x128xbf16>, vector<8x128xf32> -> vector<8x128xf32>
    %21 = vector.broadcast %18 : vector<1x128xf32> to vector<8x128xf32>
    %22 = arith.addf %20, %21 : vector<8x128xf32>
    %cst_17 = arith.constant 0.000000e+00 : f32
    %23 = vector.broadcast %cst_17 : f32 to vector<8x128xf32>
    %24 = arith.maximumf %22, %23 : vector<8x128xf32>
    %c0_18 = arith.constant 0 : index
    %c0_19 = arith.constant 0 : index
    %25 = vector.load %arg8[%c0_18, %c0_19] : memref<128x128xbf16, #tpu.memory_space<vmem>>, vector<128x128xbf16>
    %c0_20 = arith.constant 0 : index
    %c0_21 = arith.constant 0 : index
    %26 = vector.load %arg9[%c0_20, %c0_21] : memref<1x128xf32, #tpu.memory_space<vmem>>, vector<1x128xf32>
    %27 = arith.truncf %24 : vector<8x128xf32> to vector<8x128xbf16>
    %cst_22 = arith.constant dense<0.000000e+00> : vector<8x128xf32>
    %28 = tpu.matmul %27, %25, %cst_22 {dimension_numbers = #tpu.dot_dimension_numbers<[1], [0], [0], [1], [0, 0, 1, 1], [], []>} : vector<8x128xbf16>, vector<128x128xbf16>, vector<8x128xf32> -> vector<8x128xf32>
    %29 = vector.broadcast %26 : vector<1x128xf32> to vector<8x128xf32>
    %30 = arith.addf %28, %29 : vector<8x128xf32>
    %cst_23 = arith.constant 0.000000e+00 : f32
    %31 = vector.broadcast %cst_23 : f32 to vector<8x128xf32>
    %32 = arith.maximumf %30, %31 : vector<8x128xf32>
    %c0_24 = arith.constant 0 : index
    %c0_25 = arith.constant 0 : index
    %33 = vector.load %arg10[%c0_24, %c0_25] : memref<128x128xbf16, #tpu.memory_space<vmem>>, vector<128x128xbf16>
    %c0_26 = arith.constant 0 : index
    %c0_27 = arith.constant 0 : index
    %34 = vector.load %arg11[%c0_26, %c0_27] : memref<1x128xf32, #tpu.memory_space<vmem>>, vector<1x128xf32>
    %35 = arith.truncf %32 : vector<8x128xf32> to vector<8x128xbf16>
    %cst_28 = arith.constant dense<0.000000e+00> : vector<8x128xf32>
    %36 = tpu.matmul %35, %33, %cst_28 {dimension_numbers = #tpu.dot_dimension_numbers<[1], [0], [0], [1], [0, 0, 1, 1], [], []>} : vector<8x128xbf16>, vector<128x128xbf16>, vector<8x128xf32> -> vector<8x128xf32>
    %37 = vector.broadcast %34 : vector<1x128xf32> to vector<8x128xf32>
    %38 = arith.addf %36, %37 : vector<8x128xf32>
    %cst_29 = arith.constant 0.000000e+00 : f32
    %39 = vector.broadcast %cst_29 : f32 to vector<8x128xf32>
    %40 = arith.maximumf %38, %39 : vector<8x128xf32>
    %c0_30 = arith.constant 0 : index
    %c0_31 = arith.constant 0 : index
    %41 = vector.load %arg12[%c0_30, %c0_31] : memref<128x128xbf16, #tpu.memory_space<vmem>>, vector<128x128xbf16>
    %c0_32 = arith.constant 0 : index
    %c0_33 = arith.constant 0 : index
    %42 = vector.load %arg13[%c0_32, %c0_33] : memref<1x128xf32, #tpu.memory_space<vmem>>, vector<1x128xf32>
    %43 = arith.truncf %40 : vector<8x128xf32> to vector<8x128xbf16>
    %cst_34 = arith.constant dense<0.000000e+00> : vector<8x128xf32>
    %44 = tpu.matmul %43, %41, %cst_34 {dimension_numbers = #tpu.dot_dimension_numbers<[1], [0], [0], [1], [0, 0, 1, 1], [], []>} : vector<8x128xbf16>, vector<128x128xbf16>, vector<8x128xf32> -> vector<8x128xf32>
    %45 = vector.broadcast %42 : vector<1x128xf32> to vector<8x128xf32>
    %46 = arith.addf %44, %45 : vector<8x128xf32>
    %cst_35 = arith.constant 0.000000e+00 : f32
    %47 = vector.broadcast %cst_35 : f32 to vector<8x128xf32>
    %48 = arith.maximumf %46, %47 : vector<8x128xf32>
    %c0_36 = arith.constant 0 : index
    %c0_37 = arith.constant 0 : index
    %49 = vector.load %arg14[%c0_36, %c0_37] : memref<128x128xbf16, #tpu.memory_space<vmem>>, vector<128x128xbf16>
    %c0_38 = arith.constant 0 : index
    %c0_39 = arith.constant 0 : index
    %50 = vector.load %arg15[%c0_38, %c0_39] : memref<1x128xf32, #tpu.memory_space<vmem>>, vector<1x128xf32>
    %51 = arith.truncf %48 : vector<8x128xf32> to vector<8x128xbf16>
    %cst_40 = arith.constant dense<0.000000e+00> : vector<8x128xf32>
    %52 = tpu.matmul %51, %49, %cst_40 {dimension_numbers = #tpu.dot_dimension_numbers<[1], [0], [0], [1], [0, 0, 1, 1], [], []>} : vector<8x128xbf16>, vector<128x128xbf16>, vector<8x128xf32> -> vector<8x128xf32>
    %53 = vector.broadcast %50 : vector<1x128xf32> to vector<8x128xf32>
    %54 = arith.addf %52, %53 : vector<8x128xf32>
    %c0_41 = arith.constant 0 : index
    %c0_42 = arith.constant 0 : index
    %55 = vector.load %arg16[%c0_41, %c0_42] : memref<8x128xf32, #tpu.memory_space<vmem>>, vector<8x128xf32>
    tpu.vector_store %arg16[%c0_41, %c0_42], %54 {strides = array<i32>} : memref<8x128xf32, #tpu.memory_space<vmem>>, vector<8x128xf32>,
    return
  }
  func.func @transform_0(%arg0: i32) -> (i32, i32) {
    %c0_i32 = arith.constant 0 : i32
    %c0_i32_0 = arith.constant 0 : i32
    return %arg0, %c0_i32 : i32, i32
  }
  func.func @transform_1(%arg0: i32) -> (i32, i32) {
    %c0_i32 = arith.constant 0 : i32
    %c0_i32_0 = arith.constant 0 : i32
    %c0_i32_1 = arith.constant 0 : i32
    return %c0_i32, %c0_i32_0 : i32, i32
  }
  func.func @transform_2(%arg0: i32) -> (i32, i32) {
    %c0_i32 = arith.constant 0 : i32
    %c0_i32_0 = arith.constant 0 : i32
    %c0_i32_1 = arith.constant 0 : i32
    return %c0_i32, %c0_i32_0 : i32, i32
  }
  func.func @transform_3(%arg0: i32) -> (i32, i32) {
    %c0_i32 = arith.constant 0 : i32
    %c0_i32_0 = arith.constant 0 : i32
    %c0_i32_1 = arith.constant 0 : i32
    return %c0_i32, %c0_i32_0 : i32, i32
  }
  func.func @transform_4(%arg0: i32) -> (i32, i32) {
    %c0_i32 = arith.constant 0 : i32
    %c0_i32_0 = arith.constant 0 : i32
    %c0_i32_1 = arith.constant 0 : i32
    return %c0_i32, %c0_i32_0 : i32, i32
  }
  func.func @transform_5(%arg0: i32) -> (i32, i32) {
    %c0_i32 = arith.constant 0 : i32
    %c0_i32_0 = arith.constant 0 : i32
    %c0_i32_1 = arith.constant 0 : i32
    return %c0_i32, %c0_i32_0 : i32, i32
  }
  func.func @transform_6(%arg0: i32) -> (i32, i32) {
    %c0_i32 = arith.constant 0 : i32
    %c0_i32_0 = arith.constant 0 : i32
    %c0_i32_1 = arith.constant 0 : i32
    return %c0_i32, %c0_i32_0 : i32, i32
  }
  func.func @transform_7(%arg0: i32) -> (i32, i32) {
    %c0_i32 = arith.constant 0 : i32
    %c0_i32_0 = arith.constant 0 : i32
    %c0_i32_1 = arith.constant 0 : i32
    return %c0_i32, %c0_i32_0 : i32, i32
  }
  func.func @transform_8(%arg0: i32) -> (i32, i32) {
    %c0_i32 = arith.constant 0 : i32
    %c0_i32_0 = arith.constant 0 : i32
    %c0_i32_1 = arith.constant 0 : i32
    return %c0_i32, %c0_i32_0 : i32, i32
  }
  func.func @transform_9(%arg0: i32) -> (i32, i32) {
    %c0_i32 = arith.constant 0 : i32
    %c0_i32_0 = arith.constant 0 : i32
    %c0_i32_1 = arith.constant 0 : i32
    return %c0_i32, %c0_i32_0 : i32, i32
  }
  func.func @transform_10(%arg0: i32) -> (i32, i32) {
    %c0_i32 = arith.constant 0 : i32
    %c0_i32_0 = arith.constant 0 : i32
    %c0_i32_1 = arith.constant 0 : i32
    return %c0_i32, %c0_i32_0 : i32, i32
  }
  func.func @transform_11(%arg0: i32) -> (i32, i32) {
    %c0_i32 = arith.constant 0 : i32
    %c0_i32_0 = arith.constant 0 : i32
    %c0_i32_1 = arith.constant 0 : i32
    return %c0_i32, %c0_i32_0 : i32, i32
  }
  func.func @transform_12(%arg0: i32) -> (i32, i32) {
    %c0_i32 = arith.constant 0 : i32
    %c0_i32_0 = arith.constant 0 : i32
    %c0_i32_1 = arith.constant 0 : i32
    return %c0_i32, %c0_i32_0 : i32, i32
  }
  func.func @transform_13(%arg0: i32) -> (i32, i32) {
    %c0_i32 = arith.constant 0 : i32
    %c0_i32_0 = arith.constant 0 : i32
    %c0_i32_1 = arith.constant 0 : i32
    return %c0_i32, %c0_i32_0 : i32, i32
  }
  func.func @transform_14(%arg0: i32) -> (i32, i32) {
    %c0_i32 = arith.constant 0 : i32
    %c0_i32_0 = arith.constant 0 : i32
    %c0_i32_1 = arith.constant 0 : i32
    return %c0_i32, %c0_i32_0 : i32, i32
  }
  func.func @transform_15(%arg0: i32) -> (i32, i32) {
    %c0_i32 = arith.constant 0 : i32
    %c0_i32_0 = arith.constant 0 : i32
    return %arg0, %c0_i32 : i32, i32
  }
}

</mosaic_0001>

<bundles_post_ra>
// kernel: nn_third_forward.1
= control target key start
LH: loop header
LB: loop body
LE: loop exit
PB: predicated region body
PF: predicated region fallthrough
CT: control target
= control target key end

     0   :  { %s2144_s0 = inlined_call_operand.hbm [shape: f32[8,288], index: 0, kind: input, shape index: {}]   ;;  %s2145_s1 = inlined_call_operand.hbm [shape: bf16[288,256], index: 1, kind: input, shape index: {}]   ;;  %s2146_s2 = inlined_call_operand.vmem [shape: f32[1,256], index: 2, kind: input, shape index: {}]   ;;  %s2147_s3 = inlined_call_operand.hbm [shape: bf16[256,128], index: 3, kind: input, shape index: {}]   ;;  %s2148_s4 = inlined_call_operand.vmem [shape: f32[1,128], index: 4, kind: input, shape index: {}]   ;;  %s2149_s5 = inlined_call_operand.hbm [shape: bf16[128,128], index: 5, kind: input, shape index: {}]   ;;  %s2150_s6 = inlined_call_operand.vmem [shape: f32[1,128], index: 6, kind: input, shape index: {}]   ;;  %s2151_s7 = inlined_call_operand.hbm [shape: bf16[128,128], index: 7, kind: input, shape index: {}]   ;;  %s2152_s8 = inlined_call_operand.vmem [shape: f32[1,128], index: 8, kind: input, shape index: {}]   ;;  %s2153_s9 = inlined_call_operand.hbm [shape: bf16[128,128], index: 9, kind: input, shape index: {}]   ;;  %s2154_s10 = inlined_call_operand.vmem [shape: f32[1,128], index: 10, kind: input, shape index: {}]   ;;  %s2155_s11 = inlined_call_operand.hbm [shape: bf16[128,128], index: 11, kind: input, shape index: {}]   ;;  %s2156_s12 = inlined_call_operand.vmem [shape: f32[1,128], index: 12, kind: input, shape index: {}]   ;;  %s2157_s13 = inlined_call_operand.hbm [shape: bf16[128,128], index: 13, kind: input, shape index: {}]   ;;  %s2158_s14 = inlined_call_operand.vmem [shape: f32[1,128], index: 14, kind: input, shape index: {}]   ;;  %s2159_s15 = inlined_call_operand.hbm [shape: f32[8,128], index: 15, kind: output, shape index: {}]  }
   0x1   :  { %2161 = sst [smem:[#allocation23_spill]] %s2159_s15 }
   0x2   :  { %20 = vsyncpa [#allocation3], 0 }
   0x3   :  { %21 = vsyncpa [#allocation6], 0 }
   0x4   :  { %22 = vsyncpa [#allocation9], 0 }
   0x5   :  { %23 = vsyncpa [#allocation12], 0 }
   0x6   :  { %24 = vsyncpa [#allocation15], 0 }
   0x7   :  { %25 = vsyncpa [#allocation4], 0  ;;  %s1851_s18 = smov [#allocation5]   ;;  %s1641_s22 = scalar_lea.hbm %s2145_s1, 4608 }
   0x8   :  { %s41_s19 = sshll.u32 %s1851_s18, 4  ;;  %p1642_p0 = scmp.ne.s32.totalorder %s2145_s1, %s1641_s22  ;;  %s42_s19 = int_to_ptr.vmem [resolvable:$true] %s41_s19 }
   0x9   :  { %p1645_p1 = scmp.lt.u32.totalorder %s1641_s22, %s2145_s1 }
   0xb   :  { %p1647_p2 = pnand %p1645_p1, %p1642_p0 }
   0xd   :  { %1650 = shalt.err (!%p1647_p2)
}
   0xe   :  { %s1651_s27 = scalar_lea.vmem %s42_s19, 4608  ;;  %p1656_p4 = scmp.lt.s32.totalorder %s42_s19, %s42_s19 }
   0xf   :  { %p1652_p3 = scmp.ne.s32.totalorder %s42_s19, %s1651_s27  ;;  %p1657_p5 = scmp.lt.s32.totalorder %s1651_s27, %s1651_s27 }
  0x11   :  { %p1658_p6 = por %p1657_p5, %p1656_p4 }
  0x13   :  { %p1659_p7 = pnand %p1658_p6, %p1652_p3 }
  0x15   :  { %1662 = shalt.err (!%p1659_p7)
}
  0x16   :  { %s1852_s28 = smov 128   ;;  %s1853_s29 = smov 8  }
  0x17   :  { %47 = dma.hbm_to_vmem [thread:$0]  %s2145_s1, 4608, %s42_s19, [#allocation6], %s1852_s28, %s1852_s28, %s1853_s29  }
  0x18   :  { %s1854_s17 = smov [#allocation8]   ;;  %s1855_s20 = smov [#allocation11]  }
  0x19   :  { %s69_s18 = sshll.u32 %s1854_s17, 4  ;;  %s97_s21 = sshll.u32 %s1855_s20, 4  ;;  %s70_s18 = int_to_ptr.vmem [resolvable:$true] %s69_s18  ;;  %s98_s21 = int_to_ptr.vmem [resolvable:$true] %s97_s21 }
  0x1a   :  { %s1663_s24 = scalar_lea.hbm %s2149_s5, 1024 }
  0x1b   :  { %p1664_p8 = scmp.ne.s32.totalorder %s2149_s5, %s1663_s24  ;;  %p1667_p9 = scmp.lt.u32.totalorder %s1663_s24, %s2149_s5 }
  0x1d   :  { %p1669_p10 = pnand %p1667_p9, %p1664_p8 }
  0x1f   :  { %1672 = shalt.err (!%p1669_p10)
}
  0x20   :  { %s1673_s1 = scalar_lea.vmem %s70_s18, 1024  ;;  %p1678_p12 = scmp.lt.s32.totalorder %s70_s18, %s70_s18 }
  0x21   :  { %p1674_p11 = scmp.ne.s32.totalorder %s70_s18, %s1673_s1  ;;  %p1679_p13 = scmp.lt.s32.totalorder %s1673_s1, %s1673_s1 }
  0x23   :  { %p1680_p0 = por %p1679_p13, %p1678_p12 }
  0x25   :  { %p1681_p1 = pnand %p1680_p0, %p1674_p11 }
  0x27   :  { %1684 = shalt.err (!%p1681_p1)
}
  0x28   :  { %s1856_s19 = smov 64   ;;  %s1857_s28 = smov 4  }
  0x29   :  { %75 = dma.hbm_to_vmem [thread:$0]  %s2149_s5, 1024, %s70_s18, [#allocation9], %s1856_s19, %s1856_s19, %s1857_s28  }
  0x2a   :  { %s1685_s17 = scalar_lea.hbm %s2153_s9, 1024 }
  0x2b   :  { %p1686_p2 = scmp.ne.s32.totalorder %s2153_s9, %s1685_s17  ;;  %p1689_p3 = scmp.lt.u32.totalorder %s1685_s17, %s2153_s9 }
  0x2d   :  { %p1691_p4 = pnand %p1689_p3, %p1686_p2 }
  0x2f   :  { %1694 = shalt.err (!%p1691_p4)
}
  0x30   :  { %s1695_s25 = scalar_lea.vmem %s98_s21, 1024  ;;  %p1700_p6 = scmp.lt.s32.totalorder %s98_s21, %s98_s21 }
  0x31   :  { %p1696_p5 = scmp.ne.s32.totalorder %s98_s21, %s1695_s25  ;;  %p1701_p7 = scmp.lt.s32.totalorder %s1695_s25, %s1695_s25 }
  0x33   :  { %p1702_p8 = por %p1701_p7, %p1700_p6 }
  0x35   :  { %p1703_p9 = pnand %p1702_p8, %p1696_p5 }
  0x37   :  { %1706 = shalt.err (!%p1703_p9)
}
  0x38   :  { %103 = dma.hbm_to_vmem [thread:$0]  %s2153_s9, 1024, %s98_s21, [#allocation12], %s1856_s19, %s1856_s19, %s1857_s28  }
  0x39   :  { %s1858_s26 = smov [#allocation2]   ;;  %s1859_s1 = smov [#allocation7]  }
  0x3a   :  { %s32_s27 = sshll.u32 %s1858_s26, 4  ;;  %s55_s29 = sshll.u32 %s1859_s1, 4  ;;  %s33_s27 = int_to_ptr.vmem [resolvable:$true] %s32_s27  ;;  %s56_s29 = int_to_ptr.vmem [resolvable:$true] %s55_s29 }
  0x3b   :  { %s1707_s16 = scalar_lea.hbm %s2144_s0, 384 }
  0x3c   :  { %p1708_p10 = scmp.ne.s32.totalorder %s2144_s0, %s1707_s16  ;;  %p1711_p11 = scmp.lt.u32.totalorder %s1707_s16, %s2144_s0 }
  0x3e   :  { %p1713_p12 = pnand %p1711_p11, %p1708_p10 }
  0x40   :  { %1716 = shalt.err (!%p1713_p12)
}
  0x41   :  { %s1717_s9 = scalar_lea.vmem %s33_s27, 384  ;;  %p1722_p0 = scmp.lt.s32.totalorder %s33_s27, %s33_s27 }
  0x42   :  { %p1718_p13 = scmp.ne.s32.totalorder %s33_s27, %s1717_s9  ;;  %p1723_p1 = scmp.lt.s32.totalorder %s1717_s9, %s1717_s9 }
  0x44   :  { %p1724_p2 = por %p1723_p1, %p1722_p0 }
  0x46   :  { %p1725_p3 = pnand %p1724_p2, %p1718_p13 }
  0x48   :  { %1728 = shalt.err (!%p1725_p3)
}
  0x49   :  { %35 = dma.hbm_to_vmem [thread:$0]  %s2144_s0, 384, %s33_s27, [#allocation3]  }
  0x4a   :  { %s1729_s18 = scalar_lea.hbm %s2147_s3, 2048 }
  0x4b   :  { %p1730_p4 = scmp.ne.s32.totalorder %s2147_s3, %s1729_s18  ;;  %p1733_p5 = scmp.lt.u32.totalorder %s1729_s18, %s2147_s3 }
  0x4d   :  { %p1735_p6 = pnand %p1733_p5, %p1730_p4 }
  0x4f   :  { %1738 = shalt.err (!%p1735_p6)
}
  0x50   :  { %s1739_s16 = scalar_lea.vmem %s56_s29, 2048  ;;  %p1744_p8 = scmp.lt.s32.totalorder %s56_s29, %s56_s29 }
  0x51   :  { %p1740_p7 = scmp.ne.s32.totalorder %s56_s29, %s1739_s16  ;;  %p1745_p9 = scmp.lt.s32.totalorder %s1739_s16, %s1739_s16 }
  0x53   :  { %p1746_p10 = por %p1745_p9, %p1744_p8 }
  0x55   :  { %p1747_p11 = pnand %p1746_p10, %p1740_p7 }
  0x57   :  { %1750 = shalt.err (!%p1747_p11)
}
  0x58   :  { %61 = dma.hbm_to_vmem [thread:$0]  %s2147_s3, 2048, %s56_s29, [#allocation6], %s1856_s19, %s1856_s19, %s1857_s28  }
  0x59   :  { %s1860_s17 = smov [#allocation10]   ;;  %s1861_s22 = smov [#allocation13]  }
  0x5a   :  { %s83_s20 = sshll.u32 %s1860_s17, 4  ;;  %s111_s23 = sshll.u32 %s1861_s22, 4  ;;  %s84_s20 = int_to_ptr.vmem [resolvable:$true] %s83_s20  ;;  %s112_s23 = int_to_ptr.vmem [resolvable:$true] %s111_s23 }
  0x5b   :  { %s1751_s24 = scalar_lea.hbm %s2151_s7, 1024 }
  0x5c   :  { %p1752_p12 = scmp.ne.s32.totalorder %s2151_s7, %s1751_s24  ;;  %p1755_p13 = scmp.lt.u32.totalorder %s1751_s24, %s2151_s7 }
  0x5e   :  { %p1757_p0 = pnand %p1755_p13, %p1752_p12 }
  0x60   :  { %1760 = shalt.err (!%p1757_p0)
}
  0x61   :  { %s1761_s3 = scalar_lea.vmem %s84_s20, 1024  ;;  %p1766_p2 = scmp.lt.s32.totalorder %s84_s20, %s84_s20 }
  0x62   :  { %p1762_p1 = scmp.ne.s32.totalorder %s84_s20, %s1761_s3  ;;  %p1767_p3 = scmp.lt.s32.totalorder %s1761_s3, %s1761_s3 }
  0x64   :  { %p1768_p4 = por %p1767_p3, %p1766_p2 }
  0x66   :  { %p1769_p5 = pnand %p1768_p4, %p1762_p1 }
  0x68   :  { %1772 = shalt.err (!%p1769_p5)
}
  0x69   :  { %89 = dma.hbm_to_vmem [thread:$0]  %s2151_s7, 1024, %s84_s20, [#allocation9], %s1856_s19, %s1856_s19, %s1857_s28  }
  0x6a   :  { %s1773_s16 = scalar_lea.hbm %s2155_s11, 1024 }
  0x6b   :  { %p1774_p6 = scmp.ne.s32.totalorder %s2155_s11, %s1773_s16  ;;  %p1777_p7 = scmp.lt.u32.totalorder %s1773_s16, %s2155_s11 }
  0x6d   :  { %p1779_p8 = pnand %p1777_p7, %p1774_p6 }
  0x6f   :  { %1782 = shalt.err (!%p1779_p8)
}
  0x70   :  { %s1783_s9 = scalar_lea.vmem %s112_s23, 1024  ;;  %p1788_p10 = scmp.lt.s32.totalorder %s112_s23, %s112_s23 }
  0x71   :  { %p1784_p9 = scmp.ne.s32.totalorder %s112_s23, %s1783_s9  ;;  %p1789_p11 = scmp.lt.s32.totalorder %s1783_s9, %s1783_s9 }
  0x73   :  { %p1790_p12 = por %p1789_p11, %p1788_p10 }
  0x75   :  { %p1791_p13 = pnand %p1790_p12, %p1784_p9 }
  0x77   :  { %1794 = shalt.err (!%p1791_p13)
}
  0x78   :  { %117 = dma.hbm_to_vmem [thread:$0]  %s2155_s11, 1024, %s112_s23, [#allocation12], %s1856_s19, %s1856_s19, %s1857_s28  }
  0x79   :  { %s1862_s21 = smov [#allocation14]   ;;  %s1795_s18 = scalar_lea.hbm %s2157_s13, 1024 }
  0x7a   :  { %s125_s24 = sshll.u32 %s1862_s21, 4  ;;  %p1796_p0 = scmp.ne.s32.totalorder %s2157_s13, %s1795_s18  ;;  %s126_s24 = int_to_ptr.vmem [resolvable:$true] %s125_s24 }
  0x7b   :  { %p1799_p1 = scmp.lt.u32.totalorder %s1795_s18, %s2157_s13 }
  0x7d   :  { %p1801_p2 = pnand %p1799_p1, %p1796_p0 }
  0x7f   :  { %1804 = shalt.err (!%p1801_p2)
}
  0x80   :  { %s1805_s30 = scalar_lea.vmem %s126_s24, 1024  ;;  %p1810_p4 = scmp.lt.s32.totalorder %s126_s24, %s126_s24 }
  0x81   :  { %p1806_p3 = scmp.ne.s32.totalorder %s126_s24, %s1805_s30  ;;  %p1811_p5 = scmp.lt.s32.totalorder %s1805_s30, %s1805_s30 }
  0x83   :  { %p1812_p6 = por %p1811_p5, %p1810_p4 }
  0x85   :  { %p1813_p7 = pnand %p1812_p6, %p1806_p3 }
  0x87   :  { %1816 = shalt.err (!%p1813_p7)
}
  0x88   :  { %131 = dma.hbm_to_vmem [thread:$0]  %s2157_s13, 1024, %s126_s24, [#allocation15], %s1856_s19, %s1856_s19, %s1857_s28  }
  0x89   :  { %1839 = dma.done.wait [#allocation3], 384  }
  0x8a   :  { %1840 = vsyncadd [#allocation3], 4294966912 }
  0x8b   :  { %1841 = dma.done.wait [#allocation6], 6656  }
  0x8c   :  { %1842 = vsyncadd [#allocation6], 4294960640 }
  0x8d   :  { %1843 = dma.done.wait [#allocation9], 2048  }
  0x8e   :  { %1844 = vsyncadd [#allocation9], 4294965248 }
  0x8f   :  { %1845 = dma.done.wait [#allocation12], 2048  }
  0x90   :  { %1846 = vsyncadd [#allocation12], 4294965248 }
  0x91   :  { %1847 = dma.done.wait [#allocation15], 1024  }
  0x92   :  { %1848 = vsyncadd [#allocation15], 4294966272  ;;  %v1531_v0 = vld [vmem:[#allocation5 + $0x4] ss:$8 sps:$4 sm:$0xff]   ;;  %v1533_v1 = vld [vmem:[#allocation5] ss:$8 sps:$4 sm:$0xff]   ;;  %v203_v60 = vlaneseq }
  0x93   :  { %397 = vmatprep.subr.bf16.mxu0 %v1531_v0  ;;  %v1534_v2 = vld [vmem:[#allocation5 + $0x14] ss:$8 sps:$4 sm:$0xff]   ;;  %v1536_v3 = vld [vmem:[#allocation5 + $0x10] ss:$8 sps:$4 sm:$0xff]   ;;  %v1537_v4 = vld [vmem:[#allocation5 + $0x24] ss:$8 sps:$4 sm:$0xff]  }
  0x94   :  { %398 = vmatpush1.bf16.msra.mxu0 %v1533_v1  ;;  %v1539_v5 = vld [vmem:[#allocation5 + $0x20] ss:$8 sps:$4 sm:$0xff]   ;;  %v1540_v6 = vld [vmem:[#allocation5 + $0x34] ss:$8 sps:$4 sm:$0xff]   ;;  %v1542_v7 = vld [vmem:[#allocation5 + $0x30] ss:$8 sps:$4 sm:$0xff]  }
  0x95   :  { %399 = vmatprep.subr.bf16.mxu0 %v1534_v2  ;;  %v1543_v8 = vld [vmem:[#allocation5 + $0x44] ss:$8 sps:$4 sm:$0xff]   ;;  %v1545_v9 = vld [vmem:[#allocation5 + $0x40] ss:$8 sps:$4 sm:$0xff]   ;;  %v1546_v10 = vld [vmem:[#allocation5 + $0x54] ss:$8 sps:$4 sm:$0xff]  }
  0x96   :  { %v1548_v11 = vld [vmem:[#allocation5 + $0x50] ss:$8 sps:$4 sm:$0xff]   ;;  %v1549_v12 = vld [vmem:[#allocation5 + $0x64] ss:$8 sps:$4 sm:$0xff]   ;;  %v1551_v15 = vld [vmem:[#allocation5 + $0x60] ss:$8 sps:$4 sm:$0xff]  }
  0x97   :  { %v160_v13 = vld [vmem:[#allocation2 + $0x8] sm:$0xff]  ;;  %v1585_v18 = vld [vmem:[#allocation7 + $0x40] sm:$0xff]   ;;  %v1587_v21 = vld [vmem:[#allocation7 + $0x48] sm:$0xff]   ;;  %v1863_v52 = vmov 0   ;;  %vm393_vm0 = vcmask 261120   ;;  %v1864_v59 = vmov 0.0  }
  0x98   :  { %400 = vmatpush1.bf16.msra.mxu0 %v1536_v3  ;;  %v200_v14 = vpack.c.bf16 %v160_v13, %v160_v13  ;;  %v1552_v16 = vld [vmem:[#allocation5 + $0x74] ss:$8 sps:$4 sm:$0xff]   ;;  %v1554_v17 = vld [vmem:[#allocation5 + $0x70] ss:$8 sps:$4 sm:$0xff]   ;;  %v1555_v19 = vld [vmem:[#allocation5 + $0x84] ss:$8 sps:$4 sm:$0xff]   ;;  %1342 = vmatprep.subr.bf16.mxu1 %v1585_v18 }
  0x99   :  { %401 = vmatprep.subr.bf16.mxu0 %v1537_v4  ;;  %v1586_v20 = vld [vmem:[#allocation7] sm:$0xff]   ;;  %v1588_v22 = vld [vmem:[#allocation7 + $0x8] sm:$0xff]   ;;  %v1589_v23 = vld [vmem:[#allocation7 + $0x50] sm:$0xff]   ;;  %v204_v61 = vshrl.u32 %v203_v60, 7  ;;  %vm1865_vm1 = vmmov 0   ;;  %s1866_s9 = smov [#allocation16]  }
  0x9a   :  { %429 = vmatprep.mubr.bf16.mxu0 %v200_v14  ;;  %1343 = vmatpush3.bf16.msra.mxu1 %v1586_v20  ;;  %v1557_v24 = vld [vmem:[#allocation5 + $0x80] ss:$8 sps:$4 sm:$0xff]   ;;  %v1558_v25 = vld [vmem:[#allocation5 + $0x94] ss:$8 sps:$4 sm:$0xff]   ;;  %v1560_v28 = vld [vmem:[#allocation5 + $0x90] ss:$8 sps:$4 sm:$0xff]  }
  0x9b   :  { %1344 = vmatprep.subr.bf16.mxu1 %v1587_v21  ;;  %v1590_v26 = vld [vmem:[#allocation7 + $0x10] sm:$0xff]   ;;  %v1591_v27 = vld [vmem:[#allocation7 + $0x58] sm:$0xff]   ;;  %v1561_v29 = vld [vmem:[#allocation5 + $0xa4] ss:$8 sps:$4 sm:$0xff]   ;;  %v205_v62 = vsub.s32 0, %v204_v61  ;;  %v209_v0 = vsub.s32 1, %v204_v61 }
  0x9c   :  { %402 = vmatpush1.bf16.msra.mxu0 %v1539_v5  ;;  %v1592_v30 = vld [vmem:[#allocation7 + $0x18] sm:$0xff]   ;;  %v1563_v31 = vld [vmem:[#allocation5 + $0xa0] ss:$8 sps:$4 sm:$0xff]   ;;  %v1567_v37 = vld [vmem:[#allocation5 + $0xc4] ss:$8 sps:$4 sm:$0xff]   ;;  %s1230_s7 = sshll.u32 %s1866_s9, 4  ;;  %s1231_s7 = int_to_ptr.vmem [resolvable:$true] %s1230_s7 }
  0x9d   :  { %403 = vmatprep.subr.bf16.mxu0 %v1540_v6  ;;  %v1593_v32 = vld [vmem:[#allocation7 + $0x60] sm:$0xff]   ;;  %v1564_v33 = vld [vmem:[#allocation5 + $0xb4] ss:$8 sps:$4 sm:$0xff]   ;;  %v1595_v35 = vld [vmem:[#allocation7 + $0x68] sm:$0xff]   ;;  %p1822_p9 = scmp.lt.s32.totalorder %s1231_s7, %s1231_s7 }
  0x9e   :  { %1345 = vmatpush3.bf16.msra.mxu1 %v1588_v22  ;;  %v1594_v34 = vld [vmem:[#allocation7 + $0x20] sm:$0xff]   ;;  %v1566_v36 = vld [vmem:[#allocation5 + $0xb0] ss:$8 sps:$4 sm:$0xff]   ;;  %v1596_v38 = vld [vmem:[#allocation7 + $0x28] sm:$0xff]  }
  0x9f   :  { %1346 = vmatprep.subr.bf16.mxu1 %v1589_v23  ;;  %v1569_v39 = vld [vmem:[#allocation5 + $0xc0] ss:$8 sps:$4 sm:$0xff]   ;;  %v1570_v40 = vld [vmem:[#allocation5 + $0xd4] ss:$8 sps:$4 sm:$0xff]   ;;  %v1572_v41 = vld [vmem:[#allocation5 + $0xd0] ss:$8 sps:$4 sm:$0xff]  }
  0xa0   :  { %404 = vmatpush1.bf16.msra.mxu0 %v1542_v7  ;;  %v1573_v42 = vld [vmem:[#allocation5 + $0xe4] ss:$8 sps:$4 sm:$0xff]   ;;  %v1575_v43 = vld [vmem:[#allocation5 + $0xe0] ss:$8 sps:$4 sm:$0xff]   ;;  %v1576_v44 = vld [vmem:[#allocation5 + $0xf4] ss:$8 sps:$4 sm:$0xff]  }
  0xa1   :  { %405 = vmatprep.subr.bf16.mxu0 %v1543_v8  ;;  %v1578_v45 = vld [vmem:[#allocation5 + $0xf0] ss:$8 sps:$4 sm:$0xff]   ;;  %v159_v46 = vld [vmem:[#allocation2] sm:$0xff]  ;;  %v1584_v50 = vld [vmem:[#allocation5 + $0x114] ss:$8 sps:$4 sm:$0xff]  }
  0xa2   :  { %1347 = vmatpush3.bf16.msra.mxu1 %v1590_v26  ;;  %v1581_v47 = vld [vmem:[#allocation5 + $0x104] ss:$8 sps:$4 sm:$0xff]   ;;  %v1579_v48 = vld [vmem:[#allocation5 + $0x100] ss:$8 sps:$4 sm:$0xff]   ;;  %v199_v49 = vpack.c.bf16 %v159_v46, %v159_v46  ;;  %v1582_v51 = vld [vmem:[#allocation5 + $0x110] ss:$8 sps:$4 sm:$0xff]  }
  0xa3   :  { %1348 = vmatprep.subr.bf16.mxu1 %v1591_v27  ;;  %v161_v53 = vld [vmem:[#allocation2 + $0x10] sm:$0xff]  ;;  %v1597_v55 = vld [vmem:[#allocation7 + $0x70] sm:$0xff]   ;;  %v198_v63 = vld [vmem:[%s2146_s2] sm:$0x3] }
  0xa4   :  { %406 = vmatpush1.bf16.msra.mxu0 %v1545_v9  ;;  %v201_v54 = vpack.c.bf16 %v161_v53, %v161_v53  ;;  %v1598_v56 = vld [vmem:[#allocation7 + $0x30] sm:$0xff]   ;;  %v1599_v57 = vld [vmem:[#allocation7 + $0x78] sm:$0xff]   ;;  %v206_v1 = vrot.slane %v198_v63, %v205_v62  ;;  %v210_v2 = vrot.slane %v198_v63, %v209_v0  ;;  %v1602_v14 = vld [vmem:[#allocation8 + $0x8] sm:$0xff]  }
  0xa5   :  { %407 = vmatprep.subr.bf16.mxu0 %v1546_v10  ;;  %v1600_v58 = vld [vmem:[#allocation7 + $0x38] sm:$0xff]   ;;  %v1606_v18 = vld [vmem:[#allocation8 + $0x28] sm:$0xff]  }
  0xa6   :  { %1349 = vmatpush3.bf16.msra.mxu1 %v1592_v30  ;;  %v1608_v20 = vld [vmem:[#allocation8 + $0x38] sm:$0xff]   ;;  %v1280_v22 = vld [vmem:[%s2148_s4] ss:$0 sm:$0xff] }
  0xa7   :  { %1350 = vmatprep.subr.bf16.mxu1 %v1593_v32  ;;  %v1611_v32 = vld [vmem:[#allocation10 + $0x10] sm:$0xff]   ;;  %v1624_v53 = vld [vmem:[#allocation11 + $0x38] sm:$0xff]   ;;  %v1630_v60 = vld [vmem:[#allocation13 + $0x28] sm:$0xff]  }
  0xa8   :  { %408 = vmatpush1.bf16.msra.mxu0 %v1548_v11  ;;  %v1306_v61 = vld [vmem:[%s2152_s8] ss:$0 sm:$0xff] }
  0xa9   :  { %409 = vmatprep.subr.bf16.mxu0 %v1549_v12  ;;  %v1601_v12 = vld [vmem:[#allocation8] sm:$0xff]  }
  0xaa   :  { %1351 = vmatpush3.bf16.msra.mxu1 %v1594_v34  ;;  %v1613_v34 = vld [vmem:[#allocation10 + $0x20] sm:$0xff]  }
  0xab   :  { %1352 = vmatprep.subr.bf16.mxu1 %v1595_v35  ;;  %v1614_v35 = vld [vmem:[#allocation10 + $0x28] sm:$0xff]  }
  0xac   :  { %410 = vmatpush1.bf16.msra.mxu0 %v1551_v15  ;;  %v1603_v15 = vld [vmem:[#allocation8 + $0x10] sm:$0xff]  }
  0xad   :  { %411 = vmatprep.subr.bf16.mxu0 %v1552_v16  ;;  %v1604_v16 = vld [vmem:[#allocation8 + $0x18] sm:$0xff]  }
  0xae   :  { %1353 = vmatpush3.bf16.msra.mxu1 %v1596_v38  ;;  %v1617_v38 = vld [vmem:[#allocation11] sm:$0xff]  }
  0xaf   :  { %1354 = vmatprep.subr.bf16.mxu1 %v1597_v55  ;;  %v1626_v55 = vld [vmem:[#allocation13 + $0x8] sm:$0xff]  }
  0xb0   :  { %412 = vmatpush1.bf16.msra.mxu0 %v1554_v17  ;;  %v1605_v17 = vld [vmem:[#allocation8 + $0x20] sm:$0xff]  }
  0xb1   :  { %413 = vmatprep.subr.bf16.mxu0 %v1555_v19  ;;  %v1607_v19 = vld [vmem:[#allocation8 + $0x30] sm:$0xff]  }
  0xb2   :  { %1355 = vmatpush3.bf16.msra.mxu1 %v1598_v56  ;;  %v1627_v56 = vld [vmem:[#allocation13 + $0x10] sm:$0xff]  }
  0xb3   :  { %1356 = vmatprep.subr.bf16.mxu1 %v1599_v57  ;;  %v1628_v57 = vld [vmem:[#allocation13 + $0x18] sm:$0xff]  }
  0xb4   :  { %414 = vmatpush1.bf16.msra.mxu0 %v1557_v24 }
  0xb5   :  { %415 = vmatprep.subr.bf16.mxu0 %v1558_v25 }
  0xb6   :  { %1357 = vmatpush3.bf16.msra.mxu1 %v1600_v58  ;;  %v1629_v58 = vld [vmem:[#allocation13 + $0x20] sm:$0xff]  }
  0xb7   :  { %1409 = vmatprep.subr.bf16.mxu1 %v1864_v59 }
  0xb8   :  { %416 = vmatpush1.bf16.msra.mxu0 %v1560_v28 }
  0xb9   :  { %417 = vmatprep.subr.bf16.mxu0 %v1561_v29  ;;  %v1609_v29 = vld [vmem:[#allocation10] sm:$0xff]  }
  0xbc   :  { %418 = vmatpush1.bf16.msra.mxu0 %v1563_v31  ;;  %v1610_v31 = vld [vmem:[#allocation10 + $0x8] sm:$0xff]  }
  0xbd   :  { %419 = vmatprep.subr.bf16.mxu0 %v1564_v33  ;;  %v1612_v33 = vld [vmem:[#allocation10 + $0x18] sm:$0xff]  }
  0xc0   :  { %420 = vmatpush1.bf16.msra.mxu0 %v1566_v36  ;;  %v1615_v36 = vld [vmem:[#allocation10 + $0x30] sm:$0xff]  }
  0xc1   :  { %421 = vmatprep.subr.bf16.mxu0 %v1567_v37  ;;  %v1616_v37 = vld [vmem:[#allocation10 + $0x38] sm:$0xff]  }
  0xc4   :  { %422 = vmatpush1.bf16.msra.mxu0 %v1569_v39  ;;  %v1618_v39 = vld [vmem:[#allocation11 + $0x8] sm:$0xff]  }
  0xc5   :  { %423 = vmatprep.subr.bf16.mxu0 %v1570_v40  ;;  %v1619_v40 = vld [vmem:[#allocation11 + $0x10] sm:$0xff]  }
  0xc8   :  { %424 = vmatpush1.bf16.msra.mxu0 %v1572_v41  ;;  %v1620_v41 = vld [vmem:[#allocation11 + $0x18] sm:$0xff]  }
  0xc9   :  { %425 = vmatprep.subr.bf16.mxu0 %v1573_v42  ;;  %v1621_v42 = vld [vmem:[#allocation11 + $0x20] sm:$0xff]  }
  0xcc   :  { %426 = vmatpush1.bf16.msra.mxu0 %v1575_v43  ;;  %v1622_v43 = vld [vmem:[#allocation11 + $0x28] sm:$0xff]  }
  0xcd   :  { %427 = vmatprep.subr.bf16.mxu0 %v1576_v44  ;;  %v1297_v44 = vld [vmem:[%s2150_s6] ss:$0 sm:$0xff] }
  0xd0   :  { %428 = vmatpush1.bf16.msra.mxu0 %v1578_v45 }
  0xd1   :  { %438 = vmatprep.subr.bf16.mxu0 %v1581_v47 }
  0xd3   :  { %430 = vmatmul.mubr.bf16.vlgmr.msra.gmra.mrb[0].mxu0 %v199_v49 }
  0xd4   :  { %439 = vmatpush1.bf16.msra.mxu0 %v1579_v48  ;;  %470 = vmatprep.mubr.bf16.mxu0 %v1863_v52  ;;  %v1623_v52 = vld [vmem:[#allocation11 + $0x30] sm:$0xff]  }
  0xd5   :  { %440 = vmatprep.subr.bf16.mxu0 %v1584_v50 }
  0xd8   :  { %441 = vmatpush1.bf16.msra.mxu0 %v1582_v51 }
  0xd9   :  { %1449 = vmatprep.subr.bf16.mxu0 %v1864_v59 }
  0xdf   :  { %1279 = vmatmul.mubr.msk.bf16.vlgmr.msra.gmra.mrb[0].mxu0 %vm393_vm0, %v201_v54  ;;  %v1625_v54 = vld [vmem:[#allocation13] sm:$0xff]  }
  0xe0   :  { %1465 = vmatprep.mubr.msk.bf16.mxu0 %vm1865_vm1, %v1864_v59  ;;  %1450 = vmatpush3.bf16.msra.mxu0 %v1617_v38 }
  0xe1   :  { %1451 = vmatprep.subr.bf16.mxu0 %v1864_v59 }
  0xe4   :  { %1452 = vmatpush3.bf16.msra.mxu0 %v1618_v39 }
  0xe5   :  { %1453 = vmatprep.subr.bf16.mxu0 %v1864_v59 }
  0xe8   :  { %1454 = vmatpush3.bf16.msra.mxu0 %v1619_v40 }
  0xe9   :  { %1455 = vmatprep.subr.bf16.mxu0 %v1864_v59 }
  0xec   :  { %1456 = vmatpush3.bf16.msra.mxu0 %v1620_v41 }
  0xed   :  { %1457 = vmatprep.subr.bf16.mxu0 %v1864_v59 }
  0xf0   :  { %1458 = vmatpush3.bf16.msra.mxu0 %v1621_v42 }
  0xf1   :  { %1459 = vmatprep.subr.bf16.mxu0 %v1864_v59 }
  0xf4   :  { %1460 = vmatpush3.bf16.msra.mxu0 %v1622_v43 }
  0xf5   :  { %1461 = vmatprep.subr.bf16.mxu0 %v1864_v59 }
  0xf8   :  { %1462 = vmatpush3.bf16.msra.mxu0 %v1623_v52 }
  0xf9   :  { %1463 = vmatprep.subr.bf16.mxu0 %v1864_v59 }
  0xfc   :  { %1464 = vmatpush3.bf16.msra.mxu0 %v1624_v53 }
  0xfd   :  { %1489 = vmatprep.subr.bf16.mxu0 %v1864_v59 }
 0x1b2   :  { %v472_v3 = vpop.f32.mrb[0].mxu0 }
 0x1b3   :  { %v1509_v4 = vadd.f32 %v472_v3, %v206_v1  ;;  %v474_v5 = vpop.f32.mrb[1].mxu0 }
 0x1b4   :  { %v1510_v6 = vadd.f32 %v474_v5, %v210_v2  ;;  %v476_v7 = vpop.f32.mrb[2].mxu0  ;;  %v1631_v5 = vld [vmem:[#allocation13 + $0x30] sm:$0xff]  }
 0x1b5   :  { %v479_v8 = vmax.f32 %v1509_v4, 0.0  ;;  %v477_v9 = vpop.f32.mrb[3].mxu0  ;;  %v1633_v7 = vld [vmem:[#allocation14] sm:$0xff]  }
 0x1b6   :  { %v480_v10 = vmax.f32 %v1510_v6, 0.0  ;;  %v1632_v6 = vld [vmem:[#allocation13 + $0x38] sm:$0xff]   ;;  %v1635_v9 = vld [vmem:[#allocation14 + $0x10] sm:$0xff]  }
 0x1b7   :  { %v514_v13 = vpack.c.bf16 %v479_v8, %v479_v8  ;;  %v1634_v8 = vld [vmem:[#allocation14 + $0x8] sm:$0xff]  }
 0x1b8   :  { %v515_v11 = vpack.c.bf16 %v480_v10, %v480_v10  ;;  %v1636_v10 = vld [vmem:[#allocation14 + $0x18] sm:$0xff]  }
 0x1ba   :  { %650 = vmatprep.mubr.bf16.mxu1 %v515_v11  ;;  %v1637_v11 = vld [vmem:[#allocation14 + $0x20] sm:$0xff]  }
 0x1bb   :  { %651 = vmatmul.mubr.bf16.vlgmr.msra.gmra.mrb[0].mxu1 %v514_v13  ;;  %v1315_v13 = vld [vmem:[%s2154_s10] ss:$0 sm:$0xff] }
 0x1bc   :  { %1410 = vmatpush3.bf16.msra.mxu1 %v1601_v12  ;;  %1425 = vmatprep.mubr.msk.bf16.mxu1 %vm1865_vm1, %v1864_v59  ;;  %v1638_v12 = vld [vmem:[#allocation14 + $0x28] sm:$0xff]  }
 0x1bd   :  { %1411 = vmatprep.subr.bf16.mxu1 %v1864_v59 }
 0x1c0   :  { %1412 = vmatpush3.bf16.msra.mxu1 %v1602_v14 }
 0x1c1   :  { %1413 = vmatprep.subr.bf16.mxu1 %v1864_v59 }
 0x1c4   :  { %1414 = vmatpush3.bf16.msra.mxu1 %v1603_v15 }
 0x1c5   :  { %1415 = vmatprep.subr.bf16.mxu1 %v1864_v59 }
 0x1c8   :  { %1416 = vmatpush3.bf16.msra.mxu1 %v1604_v16 }
 0x1c9   :  { %1417 = vmatprep.subr.bf16.mxu1 %v1864_v59 }
 0x1cc   :  { %1418 = vmatpush3.bf16.msra.mxu1 %v1605_v17 }
 0x1cd   :  { %1419 = vmatprep.subr.bf16.mxu1 %v1864_v59 }
 0x1d0   :  { %1420 = vmatpush3.bf16.msra.mxu1 %v1606_v18 }
 0x1d1   :  { %1421 = vmatprep.subr.bf16.mxu1 %v1864_v59 }
 0x1d4   :  { %1422 = vmatpush3.bf16.msra.mxu1 %v1607_v19 }
 0x1d5   :  { %1423 = vmatprep.subr.bf16.mxu1 %v1864_v59 }
 0x1d8   :  { %1424 = vmatpush3.bf16.msra.mxu1 %v1608_v20 }
 0x1d9   :  { %1429 = vmatprep.subr.bf16.mxu1 %v1864_v59 }
 0x28e   :  { %v1358_v21 = vpop.f32.mrb[0].mxu1 }
 0x28f   :  { %v1359_v23 = vpop.f32.mrb[1].mxu1 }
 0x290   :  { %v1360_v24 = vadd.f32 %v1359_v23, %v1358_v21  ;;  %v1361_v25 = vpop.f32.mrb[2].mxu1  ;;  %v1639_v21 = vld [vmem:[#allocation14 + $0x30] sm:$0xff]   ;;  %v1324_v23 = vld [vmem:[%s2156_s12] ss:$0 sm:$0xff]  ;;  %s1817_s12 = scalar_lea.vmem %s1231_s7, 128 }
 0x291   :  { %v1362_v26 = vpop.f32.mrb[3].mxu1  ;;  %p1818_p8 = scmp.ne.s32.totalorder %s1231_s7, %s1817_s12  ;;  %p1823_p10 = scmp.lt.s32.totalorder %s1817_s12, %s1817_s12 }
 0x292   :  { %v653_v27 = vadd.f32 %v1360_v24, %v1280_v22  ;;  %v1640_v22 = vld [vmem:[#allocation14 + $0x38] sm:$0xff]  }
 0x293   :  { %p1824_p11 = por %p1823_p10, %p1822_p9 }
 0x294   :  { %v658_v28 = vmax.f32 %v653_v27, 0.0 }
 0x295   :  { %p1825_p12 = pnand %p1824_p11, %p1818_p8 }
 0x296   :  { %v676_v30 = vpack.c.bf16 %v658_v28, %v658_v28 }
 0x298   :  { %1426 = vmatmul.mubr.bf16.vlgmr.msra.gmra.mrb[4].mxu1 %v676_v30 }
 0x299   :  { %1430 = vmatpush3.bf16.msra.mxu1 %v1609_v29  ;;  %1445 = vmatprep.mubr.msk.bf16.mxu1 %vm1865_vm1, %v1864_v59 }
 0x29a   :  { %1431 = vmatprep.subr.bf16.mxu1 %v1864_v59 }
 0x29d   :  { %1432 = vmatpush3.bf16.msra.mxu1 %v1610_v31  ;;  %v1333_v31 = vld [vmem:[%s2158_s14] ss:$0 sm:$0xff] }
 0x29e   :  { %1433 = vmatprep.subr.bf16.mxu1 %v1864_v59 }
 0x2a1   :  { %1434 = vmatpush3.bf16.msra.mxu1 %v1611_v32 }
 0x2a2   :  { %1435 = vmatprep.subr.bf16.mxu1 %v1864_v59 }
 0x2a5   :  { %1436 = vmatpush3.bf16.msra.mxu1 %v1612_v33 }
 0x2a6   :  { %1437 = vmatprep.subr.bf16.mxu1 %v1864_v59 }
 0x2a9   :  { %1438 = vmatpush3.bf16.msra.mxu1 %v1613_v34 }
 0x2aa   :  { %1439 = vmatprep.subr.bf16.mxu1 %v1864_v59 }
 0x2ad   :  { %1440 = vmatpush3.bf16.msra.mxu1 %v1614_v35 }
 0x2ae   :  { %1441 = vmatprep.subr.bf16.mxu1 %v1864_v59 }
 0x2b1   :  { %1442 = vmatpush3.bf16.msra.mxu1 %v1615_v36 }
 0x2b2   :  { %1443 = vmatprep.subr.bf16.mxu1 %v1864_v59 }
 0x2b5   :  { %1444 = vmatpush3.bf16.msra.mxu1 %v1616_v37 }
 0x2b6   :  { %1469 = vmatprep.subr.bf16.mxu1 %v1864_v59 }
 0x36b   :  { %v765_v45 = vpop.f32.mrb[4].mxu1 }
 0x36c   :  { %v766_v46 = vadd.f32 %v1297_v44, %v765_v45  ;;  %v1427_v47 = vpop.f32.mrb[5].mxu1 }
 0x36d   :  { %v768_v48 = vpop.f32.mrb[6].mxu1 }
 0x36e   :  { %v771_v49 = vmax.f32 %v766_v46, 0.0  ;;  %v1428_v50 = vpop.f32.mrb[7].mxu1 }
 0x370   :  { %v789_v51 = vpack.c.bf16 %v771_v49, %v771_v49 }
 0x372   :  { %1446 = vmatmul.mubr.bf16.vlgmr.msra.gmra.mrb[8].mxu1 %v789_v51 }
 0x373   :  { %1485 = vmatprep.mubr.msk.bf16.mxu1 %vm1865_vm1, %v1864_v59  ;;  %1470 = vmatpush3.bf16.msra.mxu1 %v1625_v54 }
 0x374   :  { %1471 = vmatprep.subr.bf16.mxu1 %v1864_v59 }
 0x377   :  { %1472 = vmatpush3.bf16.msra.mxu1 %v1626_v55 }
 0x378   :  { %1473 = vmatprep.subr.bf16.mxu1 %v1864_v59 }
 0x37b   :  { %1474 = vmatpush3.bf16.msra.mxu1 %v1627_v56 }
 0x37c   :  { %1475 = vmatprep.subr.bf16.mxu1 %v1864_v59 }
 0x37f   :  { %1476 = vmatpush3.bf16.msra.mxu1 %v1628_v57 }
 0x380   :  { %1477 = vmatprep.subr.bf16.mxu1 %v1864_v59 }
 0x383   :  { %1478 = vmatpush3.bf16.msra.mxu1 %v1629_v58 }
 0x384   :  { %1479 = vmatprep.subr.bf16.mxu1 %v1864_v59 }
 0x387   :  { %1480 = vmatpush3.bf16.msra.mxu1 %v1630_v60 }
 0x388   :  { %1481 = vmatprep.subr.bf16.mxu1 %v1864_v59 }
 0x38b   :  { %1482 = vmatpush3.bf16.msra.mxu1 %v1631_v5 }
 0x38c   :  { %1483 = vmatprep.subr.bf16.mxu1 %v1864_v59 }
 0x38f   :  { %1484 = vmatpush3.bf16.msra.mxu1 %v1632_v6 }
 0x445   :  { %v878_v62 = vpop.f32.mrb[8].mxu1 }
 0x446   :  { %v879_v63 = vadd.f32 %v1306_v61, %v878_v62  ;;  %v1447_v0 = vpop.f32.mrb[9].mxu1 }
 0x447   :  { %v881_v1 = vpop.f32.mrb[10].mxu1 }
 0x448   :  { %v884_v2 = vmax.f32 %v879_v63, 0.0  ;;  %v1448_v3 = vpop.f32.mrb[11].mxu1 }
 0x44a   :  { %v902_v4 = vpack.c.bf16 %v884_v2, %v884_v2 }
 0x44c   :  { %1466 = vmatmul.mubr.bf16.vlgmr.msra.gmra.mrb[4].mxu0 %v902_v4 }
 0x44d   :  { %1505 = vmatprep.mubr.msk.bf16.mxu0 %vm1865_vm1, %v1864_v59  ;;  %1490 = vmatpush3.bf16.msra.mxu0 %v1633_v7 }
 0x44e   :  { %1491 = vmatprep.subr.bf16.mxu0 %v1864_v59 }
 0x451   :  { %1492 = vmatpush3.bf16.msra.mxu0 %v1634_v8 }
 0x452   :  { %1493 = vmatprep.subr.bf16.mxu0 %v1864_v59 }
 0x455   :  { %1494 = vmatpush3.bf16.msra.mxu0 %v1635_v9 }
 0x456   :  { %1495 = vmatprep.subr.bf16.mxu0 %v1864_v59 }
 0x459   :  { %1496 = vmatpush3.bf16.msra.mxu0 %v1636_v10 }
 0x45a   :  { %1497 = vmatprep.subr.bf16.mxu0 %v1864_v59 }
 0x45d   :  { %1498 = vmatpush3.bf16.msra.mxu0 %v1637_v11 }
 0x45e   :  { %1499 = vmatprep.subr.bf16.mxu0 %v1864_v59 }
 0x461   :  { %1500 = vmatpush3.bf16.msra.mxu0 %v1638_v12 }
 0x462   :  { %1501 = vmatprep.subr.bf16.mxu0 %v1864_v59 }
 0x465   :  { %1502 = vmatpush3.bf16.msra.mxu0 %v1639_v21 }
 0x466   :  { %1503 = vmatprep.subr.bf16.mxu0 %v1864_v59 }
 0x469   :  { %1504 = vmatpush3.bf16.msra.mxu0 %v1640_v22 }
 0x51f   :  { %v991_v14 = vpop.f32.mrb[4].mxu0 }
 0x520   :  { %v992_v15 = vadd.f32 %v1315_v13, %v991_v14  ;;  %v1467_v16 = vpop.f32.mrb[5].mxu0 }
 0x521   :  { %v994_v17 = vpop.f32.mrb[6].mxu0 }
 0x522   :  { %v997_v18 = vmax.f32 %v992_v15, 0.0  ;;  %v1468_v19 = vpop.f32.mrb[7].mxu0 }
 0x524   :  { %v1015_v20 = vpack.c.bf16 %v997_v18, %v997_v18 }
 0x526   :  { %1486 = vmatmul.mubr.bf16.vlgmr.msra.gmra.mrb[12].mxu1 %v1015_v20 }
 0x5f9   :  { %v1104_v24 = vpop.f32.mrb[12].mxu1 }
 0x5fa   :  { %v1105_v25 = vadd.f32 %v1324_v23, %v1104_v24  ;;  %v1487_v26 = vpop.f32.mrb[13].mxu1 }
 0x5fb   :  { %v1107_v27 = vpop.f32.mrb[14].mxu1 }
 0x5fc   :  { %v1110_v28 = vmax.f32 %v1105_v25, 0.0  ;;  %v1488_v29 = vpop.f32.mrb[15].mxu1 }
 0x5fe   :  { %v1128_v30 = vpack.c.bf16 %v1110_v28, %v1110_v28 }
 0x600   :  { %1506 = vmatmul.mubr.bf16.vlgmr.msra.gmra.mrb[8].mxu0 %v1128_v30 }
 0x6d3   :  { %v1217_v59 = vpop.f32.mrb[8].mxu0 }
 0x6d4   :  { %v1218_v32 = vadd.f32 %v1333_v31, %v1217_v59  ;;  %v1507_v33 = vpop.f32.mrb[9].mxu0 }
 0x6d5   :  { %v1220_v34 = vpop.f32.mrb[10].mxu0 }
 0x6d6   :  { %1223 = vst [vmem:[#allocation16] sm:$0xff] %v1218_v32  ;;  %v1508_v35 = vpop.f32.mrb[11].mxu0 }
 0x6d7   :  { %1828 = shalt.err (!%p1825_p12)
}
 0x6d8   :  { %s2162_s24 = sld [smem:[#allocation23_spill]] }
 0x6de   :  { %s1829_s14 = scalar_lea.hbm %s2162_s24, 128 }
 0x6df   :  { %p1830_p13 = scmp.ne.s32.totalorder %s2162_s24, %s1829_s14  ;;  %p1833_p0 = scmp.lt.u32.totalorder %s1829_s14, %s2162_s24 }
 0x6e1   :  { %p1835_p1 = pnand %p1833_p0, %p1830_p13 }
 0x6e3   :  { %1838 = shalt.err (!%p1835_p1)
}
 0x6e4   :  { %1233 = dma.vmem_to_hbm [thread:$0]  %s1231_s7, 128, %s2162_s24, [#allocation4]  }
 0x6e5   :  { %1849 = dma.done.wait [#allocation4], 128  }
 0x6e6   :  { %1850 = vsyncadd [#allocation4], 4294967168 }
 0x6e7   :  { %1237 = vsyncpa [#allocation3], 1 }
 0x6e8   :  { %1238 = vsyncpa [#allocation6], 1 }
 0x6e9   :  { %1239 = vsyncpa [#allocation9], 1 }
 0x6ea   :  { %1240 = vsyncpa [#allocation12], 1 }
 0x6eb   :  { %1241 = vsyncpa [#allocation15], 1 }
 0x6ec   :  { %1242 = vsyncpa [#allocation4], 1 }

</bundles_post_ra>
